<compile_context>
chip_gen: v5e
topology: v5e:2x2
jax: 0.10.0
libtpu: 0.0.40
codegen_flags: <defaults>
</compile_context>

<pallas_src>
import functools

import jax
import jax.numpy as jnp
from jax import lax
from jax.experimental import pallas as pl
from jax.experimental.pallas import tpu as pltpu


# ---------------------------------------------------------------------------
# Kernels
# ---------------------------------------------------------------------------

def _finish(xf, acc, o_ref, *, alpha, beta, local_size):
    # AvgPool divides by the kernel volume == local_size; fold into alpha.
    k = float(alpha) / float(local_size)
    y = 1.0 + k * acc                      # y >= 1 (in valid lanes)
    if float(beta) == 0.75:
        # y**-0.75 == rsqrt(y * sqrt(y)): two cheap EUP ops, no divide.
        inv_div = lax.rsqrt(y * jnp.sqrt(y))
    else:
        inv_div = jnp.exp(-float(beta) * jnp.log(y))
    o_ref[...] = (xf * inv_div).astype(o_ref.dtype)


def _lrn_kernel_band(band_ref, x_ref, o_ref, *, alpha, beta, local_size):
    # band_ref: (C, C) resident 0/1 window matrix (constant block index).
    # x_ref / o_ref block: (C, TILE_HW)  (batch dim squeezed by the BlockSpec)
    xf = x_ref[...].astype(jnp.float32)    # cast first, then square (f32 precision)
    sq = xf * xf
    # Banded 0/1 matmul on the (otherwise idle) MXU performs the windowed
    # cross-channel sum and handles channel-boundary masking for free.
    # HIGHEST precision keeps the f32 sum exact-enough without any hi/lo split.
    acc = jnp.dot(band_ref[...], sq,
                  preferred_element_type=jnp.float32,
                  precision=lax.Precision.HIGHEST)
    _finish(xf, acc, o_ref, alpha=alpha, beta=beta, local_size=local_size)


def _lrn_kernel_noband(x_ref, o_ref, *, alpha, beta):
    # local_size == 1: the "window sum" is just x^2.
    xf = x_ref[...].astype(jnp.float32)
    sq = xf * xf
    _finish(xf, sq, o_ref, alpha=alpha, beta=beta, local_size=1)


# ---------------------------------------------------------------------------
# Wrapper helpers
# ---------------------------------------------------------------------------

def _vmem_capacity_bytes():
    # Per-generation VMEM capacity (v5e/v6e: 128 MiB, v7x: 64 MiB per core).
    try:
        return int(pltpu.get_tpu_info().vmem_capacity_bytes)
    except Exception:
        return 64 * 1024 * 1024  # conservative (v7x-sized) fallback


def _pick_tile_hw(N, C, HW, itemsize, vmem_cap):
    """Largest lane-dense spatial tile whose VMEM working set fits the budget."""
    total_cols = pl.cdiv(HW, 128)
    # Working-set budget: half of physical VMEM, capped.
    budget = min(vmem_cap // 2, 64 * 1024 * 1024)
    # Per 128-lane column: double-buffered input + output blocks plus ~4 live
    # f32 temporaries inside the kernel.
    per_col = C * 128 * (4 * itemsize + 4 * 4)
    max_cols_budget = max(1, budget // per_col)
    # Also cap a single input block at ~8 MiB so per-step DMAs stay reasonable.
    max_cols_block = max(1, (8 * 1024 * 1024) // (C * 128 * itemsize))
    cols = max(1, min(total_cols, max_cols_budget, max_cols_block))
    # Only on 2-TensorCore parts (v7x: 64 MiB VMEM/TC) keep >= 2 grid steps so
    # both cores get work; on single-TC v5e/v6e splitting is pure overhead.
    if vmem_cap <= 64 * 1024 * 1024:
        while cols > 1 and N * pl.cdiv(HW, cols * 128) < 2:
            cols //= 2
    if cols >= total_cols:
        # One block covers the whole spatial axis; use the exact extent so the
        # block shape equals the array dim (no (8,128) divisibility needed).
        return HW
    return cols * 128


def _normalize_tile(tile_hw, HW):
    tile_hw = int(tile_hw)
    if tile_hw >= HW:
        return HW
    tile_hw = max(128, (tile_hw // 128) * 128)
    return HW if tile_hw > HW else tile_hw


def _band_matrix(C, local_size):
    # band[c, k] = 1 iff k lies in the channel window
    # [c - pad, c - pad + local_size - 1]; pad matches PyTorch int((ls-1)/2).
    pad = int((local_size - 1.0) / 2)
    c = jnp.arange(C, dtype=jnp.int32)[:, None]
    k = jnp.arange(C, dtype=jnp.int32)[None, :]
    off = k - c
    return ((off >= -pad) & (off <= local_size - 1 - pad)).astype(jnp.float32)


# ---------------------------------------------------------------------------
# Public entry point
# ---------------------------------------------------------------------------

def lrn(x, *, local_size=1, alpha=1.0, beta=0.75, tile_hw=None):
    """x: (N, C, H, W) NCHW. Returns same shape/dtype. ACROSS_CHANNELS=True."""
    # TODO(synk): ACROSS_CHANNELS=False (spatial AvgPool2d variant) not implemented.
    N, C, H, W = x.shape
    HW = H * W
    itemsize = jnp.dtype(x.dtype).itemsize
    vmem_cap = _vmem_capacity_bytes()

    if tile_hw is None:
        tile_hw = _pick_tile_hw(N, C, HW, itemsize, vmem_cap)
    tile_hw = _normalize_tile(tile_hw, HW)

    x2 = x.reshape(N, C, HW)
    grid = (N, pl.cdiv(HW, tile_hw))

    x_spec = pl.BlockSpec((None, C, tile_hw), lambda n, s: (n, 0, s))
    o_spec = pl.BlockSpec((None, C, tile_hw), lambda n, s: (n, 0, s))

    if local_size > 1:
        band = _band_matrix(C, local_size)
        in_specs = [pl.BlockSpec((C, C), lambda n, s: (0, 0)), x_spec]
        args = (band, x2)
        kernel = functools.partial(
            _lrn_kernel_band, alpha=alpha, beta=beta, local_size=local_size
        )
        band_bytes = 2 * C * C * 4
    else:
        in_specs = [x_spec]
        args = (x2,)
        kernel = functools.partial(_lrn_kernel_noband, alpha=alpha, beta=beta)
        band_bytes = 0

    # VMEM limit derived from the actual working set (double-buffered in/out
    # blocks + live f32 temporaries + resident band), with generous headroom.
    io_block = C * tile_hw * itemsize
    temps = 4 * C * tile_hw * 4
    working_set = 4 * io_block + temps + band_bytes
    vmem_limit = int(min(vmem_cap, max(32 * 1024 * 1024, 2 * working_set)))

    cost = pl.CostEstimate(
        flops=int(N * C * HW * (2 * local_size + 8)),
        transcendentals=int(2 * N * C * HW),
        bytes_accessed=int(2 * N * C * HW * itemsize + band_bytes),
    )

    out = pl.pallas_call(
        kernel,
        out_shape=jax.ShapeDtypeStruct((N, C, HW), x.dtype),
        grid_spec=pltpu.PrefetchScalarGridSpec(
            num_scalar_prefetch=0,
            grid=grid,
            in_specs=in_specs,
            out_specs=o_spec,
        ),
        compiler_params=pltpu.CompilerParams(
            dimension_semantics=("parallel", "parallel"),
            vmem_limit_bytes=vmem_limit,
        ),
        cost_estimate=cost,
    )(*args)

    return out.reshape(N, C, H, W)


# ---------------------------------------------------------------------------
# Pure-JAX reference + self-test
# ---------------------------------------------------------------------------

def _lrn_ref(x, *, local_size=1, alpha=1.0, beta=0.75):
    # Mirrors the PyTorch forward (ACROSS_CHANNELS=True).
    pad = int((local_size - 1.0) / 2)
    C = x.shape[1]
    sq = x.astype(jnp.float32) ** 2
    sqp = jnp.pad(sq, ((0, 0), (pad, pad), (0, 0), (0, 0)))
    acc = sum(sqp[:, d:d + C] for d in range(local_size))
    div = (1.0 + alpha * acc / local_size) ** beta
    return (x.astype(jnp.float32) / div).astype(x.dtype)


if __name__ == "__main__":
    key = jax.random.PRNGKey(0)
    N, C, H, W = 2, 4, 16, 16
    x = jax.random.normal(key, (N, C, H, W), dtype=jnp.float32)

    # Default module config: local_size=1, alpha=1.0, beta=0.75.
    y = jax.block_until_ready(lrn(x, local_size=1, alpha=1.0, beta=0.75))
    y_ref = _lrn_ref(x, local_size=1, alpha=1.0, beta=0.75)
    assert y.shape == x.shape and y.dtype == x.dtype
    assert jnp.allclose(y, y_ref, atol=1e-5, rtol=1e-5)

    # Nontrivial channel window (local_size=3): banded-matmul path.
    y3 = jax.block_until_ready(lrn(x, local_size=3, alpha=1e-4, beta=0.75))
    y3_ref = _lrn_ref(x, local_size=3, alpha=1e-4, beta=0.75)
    assert jnp.allclose(y3, y3_ref, atol=1e-5, rtol=1e-5)

    # Non-default beta: exp/log path.
    y5 = jax.block_until_ready(lrn(x, local_size=3, alpha=1e-4, beta=0.5))
    y5_ref = _lrn_ref(x, local_size=3, alpha=1e-4, beta=0.5)
    assert jnp.allclose(y5, y5_ref, atol=1e-5, rtol=1e-5)

    # Ragged spatial extent with an explicit small tile: exercises the
    # masked-edge-block (no wrapper pad/slice) path.
    xe = jax.random.normal(jax.random.PRNGKey(1), (2, 4, 20, 20), dtype=jnp.float32)
    ye = jax.block_until_ready(lrn(xe, local_size=3, alpha=1e-4, beta=0.75, tile_hw=256))
    ye_ref = _lrn_ref(xe, local_size=3, alpha=1e-4, beta=0.75)
    assert jnp.allclose(ye, ye_ref, atol=1e-5, rtol=1e-5)

    print("KERNEL_OK")
</pallas_src>

<mosaic_0001>
module attributes {stable_mosaic.version = 11 : i64} {
  func.func @_lrn_kernel_noband(%arg0: i32, %arg1: i32, %arg2: memref<1x4x256xf32, #tpu.memory_space<vmem>>, %arg3: memref<1x4x256xf32, #tpu.memory_space<vmem>>) attributes {dimension_semantics = [#tpu.dimension_semantics<parallel>, #tpu.dimension_semantics<parallel>], iteration_bounds = array<i64: 2, 1>, scalar_prefetch = 0 : i64, scratch_operands = 0 : i64, tpu.core_type = #tpu.core_type<tc>, window_params = [{transform_indices = @transform_0, window_bounds = array<i64: 1, 4, 256>}, {transform_indices = @transform_1, window_bounds = array<i64: 1, 4, 256>}]} {
    %c0 = arith.constant 0 : index
    %c0_0 = arith.constant 0 : index
    %c0_1 = arith.constant 0 : index
    %0 = vector.load %arg2[%c0, %c0_0, %c0_1] : memref<1x4x256xf32, #tpu.memory_space<vmem>>, vector<1x4x256xf32>
    %1 = vector.shape_cast %0 : vector<1x4x256xf32> to vector<4x256xf32>
    %2 = arith.mulf %1, %1 : vector<4x256xf32>
    %cst = arith.constant 1.000000e+00 : f32
    %3 = vector.broadcast %cst : f32 to vector<4x256xf32>
    %4 = arith.mulf %3, %2 : vector<4x256xf32>
    %cst_2 = arith.constant 1.000000e+00 : f32
    %5 = vector.broadcast %cst_2 : f32 to vector<4x256xf32>
    %6 = arith.addf %5, %4 : vector<4x256xf32>
    %7 = math.sqrt %6 : vector<4x256xf32>
    %8 = arith.mulf %6, %7 : vector<4x256xf32>
    %9 = math.rsqrt %8 : vector<4x256xf32>
    %10 = arith.mulf %1, %9 : vector<4x256xf32>
    %c0_3 = arith.constant 0 : index
    %c0_4 = arith.constant 0 : index
    %c0_5 = arith.constant 0 : index
    %11 = vector.load %arg3[%c0_3, %c0_4, %c0_5] : memref<1x4x256xf32, #tpu.memory_space<vmem>>, vector<1x4x256xf32>
    %12 = vector.shape_cast %11 : vector<1x4x256xf32> to vector<4x256xf32>
    %13 = vector.shape_cast %10 : vector<4x256xf32> to vector<1x4x256xf32>
    tpu.vector_store %arg3[%c0_3, %c0_4, %c0_5], %13 {strides = array<i32>} : memref<1x4x256xf32, #tpu.memory_space<vmem>>, vector<1x4x256xf32>,
    return
  }
  func.func @transform_0(%arg0: i32, %arg1: i32) -> (i32, i32, i32) {
    %c0_i32 = arith.constant 0 : i32
    %c0_i32_0 = arith.constant 0 : i32
    return %arg0, %c0_i32, %arg1 : i32, i32, i32
  }
  func.func @transform_1(%arg0: i32, %arg1: i32) -> (i32, i32, i32) {
    %c0_i32 = arith.constant 0 : i32
    %c0_i32_0 = arith.constant 0 : i32
    return %arg0, %c0_i32, %arg1 : i32, i32, i32
  }
}

</mosaic_0001>

<bundles_post_ra>
// kernel: tpu_custom_call.1
= control target key start
LH: loop header
LB: loop body
LE: loop exit
PB: predicated region body
PF: predicated region fallthrough
CT: control target
= control target key end

     0   :  { %6 = vsyncpa [#allocation3], 0  ;;  %s617_s0 = inlined_call_operand.hbm [shape: f32[2,4,256], index: 0, kind: input, shape index: {}]   ;;  %s618_s1 = inlined_call_operand.hbm [shape: f32[2,4,256], index: 1, kind: output, shape index: {}]  }
   0x1   :  { %8 = vsyncpa [#allocation3 + $0x1], 0 }
   0x2   :  { %9 = vsyncpa [#allocation4], 0 }
   0x3   :  { %11 = vsyncpa [#allocation4 + $0x1], 0  ;;  %s493_s6 = smov 0   ;;  %s495_s7 = smov 0  }
   0x4   :  { %s497_s8 = smov 0   ;;  %s499_s9 = smov 0  }
   0x5   :  { %s501_s10 = smov 0   ;;  %s503_s11 = smov 0  }
   0x6 LB: > { %s286_s12 = sadd.s32 4294967295, %s481_s11   ;;  %s287_s13 = sadd.s32 4294967294, %s481_s11   ;;  %s481_s11 = sphi %s503_s11, %s17_s11   ;;  %s477_s10 = sphi %s501_s10, %s627_s10   ;;  %s473_s9 = sphi %s499_s9, %s626_s9   ;;  %s469_s8 = sphi %s497_s8, %s625_s8   ;;  %s465_s7 = sphi %s495_s7, %s624_s7   ;;  %s461_s6 = sphi %s493_s6, %s623_s6  }
   0x7   : > { %s29_s14 = sadd.s32 1, %s477_s10  ;;  %s38_s15 = sadd.s32 1, %s469_s8 }
   0x8   : > { %p31_p0 = scmp.ge.s32.totalorder %s29_s14, 2  ;;  %p45_p1 = scmp.ne.s32.totalorder %s469_s8, %s465_s7 }
   0x9   : > { %p46_p2 = scmp.eq.s32.totalorder %s481_s11, 0  ;;  %p51_p3 = scmp.ne.s32.totalorder %s465_s7, %s461_s6 }
   0xa   : > { %s629_s14 = smov (%p31_p0, %s29_s14), 0  ;;  %p52_p5 = scmp.eq.s32.totalorder %s286_s12, 0 }
   0xb   : > { %p534_p4 = por %p46_p2, %p45_p1  ;;  %s33_s17 = ssub.s32 %s477_s10, %s629_s14 }
   0xc   : > { %p77_p6 = scmp.eq.s32.totalorder %s286_s12, 1  ;;  %p36_p7 = scmp.eq.s32.totalorder %s33_s17, 0 }
   0xd   : > { %p540_p8 = por %p52_p5, %p51_p3  ;;  %p83_p10 = scmp.eq.s32.totalorder %s287_s13, 1 }
   0xe   : > { %p544_p9 = por %p77_p6, %p45_p1  ;;  %p289_p12 = scmp.ge.s32.totalorder %s481_s11, 2 }
   0xf   : > { %s549_s20 = scalar_select %p36_p7, %s469_s8, %s38_s15  }
  0x10   : > { %p551_p11 = por %p83_p10, %p51_p3  ;;  %p315_p13 = scmp.lt.s32.totalorder %s481_s11, 2 }
  0x11   : > { %s103_s22 = sand.u32 1, %s469_s8   ;;  %s301_s24 = sshll.u32 %s477_s10, 3 }
  0x12   : > { %s290_s23 = sshll.u32 %s103_s22, 3  ;;  %s114_s27 = scalar_lea.hbm %s617_s0, %s301_s24 }
  0x13   : > { %s107_s28 = scalar_lea.vmem [#allocation2], %s290_s23  ;;  %s116_s30 = sshll.u32 %s114_s27, 4  ;;  %s117_s30 = int_to_ptr.hbm [resolvable:$true] %s116_s30 }
  0x14   : > { %s118_s29 = sshll.u32 %s107_s28, 4  ;;  %p308_p0 = pnand %p315_p13, %p534_p4  ;;  %s119_s29 = int_to_ptr.vmem [resolvable:$true] %s118_s29 }
  0x15   : > { %p293_p1 = scmp.ge.s32.totalorder %s481_s11, 1  ;;  %p123_p2 = scmp.lt.s32.totalorder %s481_s11, 3 }
  0x16   : > { %s104_s2 = scalar_lea.sflag [#allocation3], %s103_s22 }
  0x17   : > { %310 = dma.hbm_to_vmem [thread:$0]  (!%p308_p0), %s117_s30, 128, %s119_s29, %s104_s2  }
  0x18   : > { %p124_p3 = pnand %p293_p1, %p123_p2 }
  0x19   : > { %s567_s3 = sand.u32 (!%p124_p3), 1, %s465_s7  }
  0x1a   : > { %127 = sbr.rel (%p124_p3) target bundleno = 83 (0x53), region = 24  ;;  %s294_s4 = sshll.u32 (!%p124_p3), %s567_s3, 3 }
  0x1b   : > { %s130_s5 = scalar_lea.sflag (!%p124_p3), [#allocation3], %s567_s3  ;;  %s133_s12 = scalar_lea.vmem (!%p124_p3), [#allocation2], %s294_s4 }
  0x1f   : > { %452 = dma.done.wait (%p540_p8), %s130_s5, 128  }
  0x20   : > { %454 = vsyncadd (%p540_p8), %s130_s5, 4294967168  ;;  %v155_v0 = vld [vmem:[%s133_s12] sm:$0xff]  ;;  %s302_s13 = sshll.u32 %s473_s9, 3  ;;  %s152_s18 = scalar_lea.vmem [#allocation5], %s294_s4 }
  0x21   : > { %v156_v1 = vmul.f32 %v155_v0, %v155_v0  ;;  %s197_s17 = scalar_lea.hbm %s618_s1, %s302_s13  ;;  %s199_s22 = sshll.u32 %s152_s18, 4  ;;  %s200_s22 = int_to_ptr.vmem [resolvable:$true] %s199_s22 }
  0x22   : > { %s201_s23 = sshll.u32 %s197_s17, 4  ;;  %s184_s9 = scalar_lea.sflag [#allocation4], %s567_s3  ;;  %s202_s23 = int_to_ptr.hbm [resolvable:$true] %s201_s23 }
  0x23   : > { %v157_v2 = vadd.f32 1.0, %v156_v1  ;;  %s413_s24 = sshra.s32 %s202_s23, 4  ;;  %s419_s28 = scalar_lea.hbm %s618_s1, 16  ;;  %s414_s24 = int_to_ptr.hbm [resolvable:$true] %s413_s24 }
  0x24   : > { %s415_s25 = scalar_lea.hbm %s414_s24, 8  ;;  %p420_p7 = scmp.lt.s32.totalorder %s414_s24, %s618_s1 }
  0x25   : > { %365 = vrsqrt.f32 %v157_v2  ;;  %vm165_vm0 = vcmp.eq.f32.partialorder %v157_v2, inf  ;;  %v168_v9 = vand.u32 2147483648, %v157_v2  ;;  %vm167_vm1 = vcmp.eq.f32.partialorder %v157_v2, 0.0  ;;  %p416_p4 = scmp.ne.s32.totalorder %s414_s24, %s415_s25  ;;  %p421_p8 = scmp.lt.s32.totalorder %s419_s28, %s415_s25 }
  0x27   : > { %p417_p5 = pnand %p416_p4, %p544_p9  ;;  %p422_p10 = por %p421_p8, %p420_p7 }
  0x29   : > { %p418_p6 = pneg %p417_p5 }
  0x2b   : > { %v366_v3 = vpop.eup %365  ;;  %p423_p13 = pnand %p422_p10, %p418_p6 }
  0x2c   : > { %v159_v4 = vmul.f32 %v366_v3, %v157_v2 }
  0x2e   : > { %v160_v5 = vmul.f32 %v366_v3, %v159_v4 }
  0x30   : > { %v161_v6 = vmul.f32 0.5, %v160_v5 }
  0x32   : > { %v162_v7 = vsub.f32 1.5, %v161_v6 }
  0x34   : > { %v163_v8 = vmul.f32 %v366_v3, %v162_v7 }
  0x36   : > { %v164_v10 = vmul.f32 %v163_v8, %v157_v2 }
  0x38   : > { %v166_v11 = vsel %vm165_vm0, %v157_v2, %v164_v10 }
  0x39   : > { %v169_v12 = vsel %vm167_vm1, %v168_v9, %v166_v11 }
  0x3a   : > { %v170_v13 = vmul.f32 %v169_v12, %v157_v2 }
  0x3c   : > { %367 = vrsqrt.f32 %v170_v13  ;;  %vm177_vm2 = vweird.f32 %v170_v13 }
  0x42   : > { %v368_v14 = vpop.eup %367 }
  0x43   : > { %v172_v15 = vmul.f32 %v368_v14, %v170_v13  ;;  %vm178_vm3 = vweird.f32 %v368_v14 }
  0x44   : > { %vm179_vm4 = vmor %vm177_vm2, %vm178_vm3 }
  0x45   : > { %v173_v16 = vmul.f32 %v368_v14, %v172_v15 }
  0x47   : > { %v174_v17 = vmul.f32 0.5, %v173_v16 }
  0x49   : > { %v175_v18 = vsub.f32 1.5, %v174_v17 }
  0x4b   : > { %v176_v19 = vmul.f32 %v368_v14, %v175_v18 }
  0x4d   : > { %v180_v20 = vsel %vm179_vm4, %v368_v14, %v176_v19 }
  0x4e   : > { %v181_v21 = vmul.f32 %v180_v20, %v155_v0 }
  0x50   : > { %182 = vst [vmem:[%s152_s18] sm:$0xff] %v181_v21 }
  0x51   : > { %426 = shalt.err (!%p423_p13)
}
  0x52   : > { %305 = dma.vmem_to_hbm [thread:$0]  (%p544_p9), %s200_s22, 128, %s202_s23, %s184_s9  }
  0x53 PF: > { %s213_s2 = sand.u32 1, %s461_s6   ;;  %p312_p0 = pnand %p289_p12, %p551_p11 }
  0x54   : > { %s214_s3 = scalar_lea.sflag [#allocation4], %s213_s2 }
  0x55   : > { %p313_p1 = pneg %p312_p0 }
  0x57   : > { %456 = dma.done.wait (%p313_p1), %s214_s3, 128  }
  0x58   : > { %458 = vsyncadd (%p313_p1), %s214_s3, 4294967168  ;;  %s17_s11 = sadd.s32 1, %s481_s11   ;;  %s623_s6 = smov %s465_s7 }
  0x59   : > { %p14_p2 = scmp.ge.s32.totalorder %s17_s11, 4   ;;  %s624_s7 = smov %s469_s8 }
  0x5a   : > { %s625_s8 = smov %s549_s20  ;;  %s626_s9 = smov %s477_s10 }
  0x5b   : > { %s627_s10 = smov %s629_s14  ;;  %16 = sbr.rel (!%p14_p2) target bundleno = 6 (0x6), region = 69 }
  0x60   :  { %220 = vsyncpa [#allocation3], 1 }
  0x61   :  { %222 = vsyncpa [#allocation3 + $0x1], 1 }
  0x62   :  { %223 = vsyncpa [#allocation4], 1 }
  0x63   :  { %225 = vsyncpa [#allocation4 + $0x1], 1 }

</bundles_post_ra>
